<compile_context>
chip_gen: v6e
topology: v6e:2x2x1
jax: 0.10.0
libtpu: 0.0.40
codegen_flags: <defaults>
</compile_context>

<pallas_src>
import jax
import jax.numpy as jnp
from jax.experimental import pallas as pl
from jax.experimental.pallas import tpu as pltpu


def _round_up(x, m):
    return ((x + m - 1) // m) * m


def lstmha_kernel(ll_w_ref, ll_b_ref, x_ref, wbd_ref, whh_ref, bias_ref,
                  out_ref, xw_ref):
    TN = x_ref.shape[0]
    H = whh_ref.shape[0]
    G = 4 * H
    K = ll_w_ref.shape[0]

    # All K per-step input projections (x_k @ W_ih^T) plus the LSTM bias in a
    # single MXU call against the block-diagonal W_ih.  Result goes to VMEM
    # scratch so each step reads a 128-lane-aligned (TN, 4H) slice.
    xw_ref[...] = (
        jnp.dot(x_ref[...], wbd_ref[...], preferred_element_type=jnp.float32)
        + bias_ref[...])

    whh = whh_ref[...]                              # (H, 4H) f32, resident

    def step(k, carry):
        h, c, acc = carry
        col = pl.multiple_of(k * G, G)              # 4H == 128 -> lane-aligned
        gates = xw_ref[:, pl.ds(col, G)] + jnp.dot(
            h, whh, preferred_element_type=jnp.float32)      # (TN, 4H) f32
        i_g = jax.nn.sigmoid(gates[:, 0:H])
        f_g = jax.nn.sigmoid(gates[:, H:2 * H])
        g_g = jnp.tanh(gates[:, 2 * H:3 * H])
        o_g = jax.nn.sigmoid(gates[:, 3 * H:4 * H])
        c = f_g * c + i_g * g_g
        h = o_g * jnp.tanh(c)
        # nn.Linear(K, 1) over the time axis, folded into the recurrence.
        acc = acc + h * ll_w_ref[k]
        return h, c, acc

    zeros = jnp.zeros((TN, H), jnp.float32)
    _, _, acc = jax.lax.fori_loop(0, K, step, (zeros, zeros, zeros))

    # With the demo H=32 this is a masked sub-128-lane store (output bytes are
    # tiny); with the module's real lstm_h_dim=128 it is already lane-dense.
    out_ref[...] = acc + ll_b_ref[0]


def lstmha_forward(x, w_ih, w_hh, b_ih, b_hh, ll_w, ll_b, *, tile_n=256):
    """x: (B, S, K, F) float32. Returns (B, S, H) float32."""
    B, S, K, F = x.shape
    H = w_hh.shape[1]
    G = 4 * H
    N = B * S

    # Row tile: multiple of 8 sublanes, capped at tile_n (default 256, the MXU
    # row dimension on v6e/v7x); N is zero-padded up to a multiple of TN.
    TN = min(tile_n, _round_up(N, 8))
    TN = max(8, (TN // 8) * 8)
    N_pad = _round_up(N, TN)

    # Lane-dense x layout: (N, K*F), streamed in bf16 (HBM-bound operand).
    x2 = x.reshape(N, K * F)
    if N_pad != N:
        x2 = jnp.pad(x2, ((0, N_pad - N), (0, 0)))
    x2 = x2.astype(jnp.bfloat16)

    # Block-diagonal input weight (K*F, K*4H): column block k holds W_ih^T, so
    # (x2 @ W_bd)[:, k*4H:(k+1)*4H] == x_k @ W_ih^T with gate slices landing on
    # 128-lane boundaries.
    wih_t = jnp.transpose(w_ih).astype(jnp.float32)                  # (F, 4H)
    w_bd = jnp.kron(jnp.eye(K, dtype=jnp.float32), wih_t).astype(jnp.bfloat16)
    # Recurrent weight stays f32: tiny, resident, keeps the recurrence exact.
    whh_t = jnp.transpose(w_hh).astype(jnp.float32)                  # (H, 4H)
    bias = jnp.tile((b_ih + b_hh).astype(jnp.float32), K).reshape(1, K * G)
    ll_w_f = ll_w.reshape(K).astype(jnp.float32)
    ll_b_f = ll_b.reshape(1).astype(jnp.float32)

    cost = pl.CostEstimate(
        flops=int(2 * N_pad * K * (F + H) * G),
        transcendentals=int(5 * N_pad * K * H),
        bytes_accessed=int(x2.size * 2 + w_bd.size * 2 + whh_t.size * 4
                           + bias.size * 4 + (K + 1) * 4 + N_pad * H * 4),
    )

    out = pl.pallas_call(
        lstmha_kernel,
        out_shape=jax.ShapeDtypeStruct((N_pad, H), jnp.float32),
        grid=(N_pad // TN,),
        in_specs=[
            pl.BlockSpec(memory_space=pltpu.MemorySpace.SMEM),   # ll_w (K,)
            pl.BlockSpec(memory_space=pltpu.MemorySpace.SMEM),   # ll_b (1,)
            pl.BlockSpec((TN, K * F), lambda i: (i, 0)),         # x stream
            pl.BlockSpec((K * F, K * G), lambda i: (0, 0)),      # block-diag W_ih
            pl.BlockSpec((H, G), lambda i: (0, 0)),              # W_hh^T
            pl.BlockSpec((1, K * G), lambda i: (0, 0)),          # fused bias
        ],
        out_specs=pl.BlockSpec((TN, H), lambda i: (i, 0)),
        scratch_shapes=[pltpu.VMEM((TN, K * G), jnp.float32)],
        compiler_params=pltpu.CompilerParams(
            dimension_semantics=("parallel",),
            vmem_limit_bytes=32 * 1024 * 1024),
        cost_estimate=cost,
    )(ll_w_f, ll_b_f, x2, w_bd, whh_t, bias)

    return out[:N].reshape(B, S, H)


def lstmha_reference(x, w_ih, w_hh, b_ih, b_hh, ll_w, ll_b):
    """Pure-JAX f32 reference mirroring the PyTorch forward exactly."""
    B, S, K, F = x.shape
    H = w_hh.shape[1]
    xs = x.reshape(B * S, K, F)
    h = jnp.zeros((B * S, H), jnp.float32)
    c = jnp.zeros((B * S, H), jnp.float32)
    outs = []
    for k in range(K):
        gates = xs[:, k, :] @ w_ih.T + h @ w_hh.T + b_ih + b_hh
        i_g = jax.nn.sigmoid(gates[:, 0:H])
        f_g = jax.nn.sigmoid(gates[:, H:2 * H])
        g_g = jnp.tanh(gates[:, 2 * H:3 * H])
        o_g = jax.nn.sigmoid(gates[:, 3 * H:4 * H])
        c = f_g * c + i_g * g_g
        h = o_g * jnp.tanh(c)
        outs.append(h)
    outputs = jnp.stack(outs, axis=1)                 # (N, K, H)
    outputs_t = jnp.transpose(outputs, (0, 2, 1))     # (N, H, K)
    ll_in = outputs_t.reshape(-1, K)                  # (N*H, K)
    ll_out = ll_in @ ll_w.reshape(K, 1) + ll_b        # (N*H, 1)
    return ll_out.reshape(B, S, H)


if __name__ == "__main__":
    # Small shapes consistent with the module's forward:
    #   x: batch * num_stock * K_lookback * feature_dim
    B, S, K, F, H = 2, 4, 12, 8, 32

    key = jax.random.PRNGKey(0)
    k_x, k_wih, k_whh, k_bih, k_bhh, k_lw, k_lb = jax.random.split(key, 7)

    # PyTorch-style LSTM init: uniform(-1/sqrt(H), 1/sqrt(H)).
    bound = 1.0 / jnp.sqrt(jnp.float32(H))
    x = jax.random.normal(k_x, (B, S, K, F), dtype=jnp.float32)
    w_ih = jax.random.uniform(k_wih, (4 * H, F), jnp.float32, -bound, bound)
    w_hh = jax.random.uniform(k_whh, (4 * H, H), jnp.float32, -bound, bound)
    b_ih = jax.random.uniform(k_bih, (4 * H,), jnp.float32, -bound, bound)
    b_hh = jax.random.uniform(k_bhh, (4 * H,), jnp.float32, -bound, bound)
    lbound = 1.0 / jnp.sqrt(jnp.float32(K))
    ll_w = jax.random.uniform(k_lw, (1, K), jnp.float32, -lbound, lbound)
    ll_b = jax.random.uniform(k_lb, (1,), jnp.float32, -lbound, lbound)

    out = lstmha_forward(x, w_ih, w_hh, b_ih, b_hh, ll_w, ll_b)
    out = jax.block_until_ready(out)

    ref = lstmha_reference(x, w_ih, w_hh, b_ih, b_hh, ll_w, ll_b)
    assert out.shape == (B, S, H), out.shape
    # Tolerance loosened vs. the pure-f32 v1: x and W_ih enter the MXU as bf16
    # (f32 accumulation); the recurrent path stays f32.
    assert jnp.allclose(out, ref, atol=2e-2, rtol=2e-2), (
        float(jnp.max(jnp.abs(out - ref))))

    print("KERNEL_OK")
</pallas_src>

<mosaic_0001>
module attributes {stable_mosaic.version = 11 : i64} {
  func.func @lstmha_kernel(%arg0: i32, %arg1: memref<12xf32, #tpu.memory_space<smem>>, %arg2: memref<1xf32, #tpu.memory_space<smem>>, %arg3: memref<8x96xbf16, #tpu.memory_space<vmem>>, %arg4: memref<96x1536xbf16, #tpu.memory_space<vmem>>, %arg5: memref<32x128xf32, #tpu.memory_space<vmem>>, %arg6: memref<1x1536xf32, #tpu.memory_space<vmem>>, %arg7: memref<8x32xf32, #tpu.memory_space<vmem>>, %arg8: memref<8x1536xf32, #tpu.memory_space<vmem>>) attributes {dimension_semantics = [#tpu.dimension_semantics<parallel>], iteration_bounds = array<i64: 1>, scalar_prefetch = 0 : i64, scratch_operands = 1 : i64, tpu.core_type = #tpu.core_type<tc>, window_params = [{transform_indices = @transform_0, window_bounds = array<i64: 12>}, {transform_indices = @transform_1, window_bounds = array<i64: 1>}, {transform_indices = @transform_2, window_bounds = array<i64: 8, 96>}, {pipeline_mode = #tpu.pipeline_mode<synchronous>, transform_indices = @transform_3, window_bounds = array<i64: 96, 1536>}, {pipeline_mode = #tpu.pipeline_mode<synchronous>, transform_indices = @transform_4, window_bounds = array<i64: 32, 128>}, {pipeline_mode = #tpu.pipeline_mode<synchronous>, transform_indices = @transform_5, window_bounds = array<i64: 1, 1536>}, {transform_indices = @transform_6, window_bounds = array<i64: 8, 32>}]} {
    %c0 = arith.constant 0 : index
    %c0_0 = arith.constant 0 : index
    %0 = vector.load %arg3[%c0, %c0_0] : memref<8x96xbf16, #tpu.memory_space<vmem>>, vector<8x96xbf16>
    %c0_1 = arith.constant 0 : index
    %c0_2 = arith.constant 0 : index
    %1 = vector.load %arg4[%c0_1, %c0_2] : memref<96x1536xbf16, #tpu.memory_space<vmem>>, vector<96x1536xbf16>
    %cst = arith.constant dense<0.000000e+00> : vector<8x1536xf32>
    %2 = tpu.matmul %0, %1, %cst {dimension_numbers = #tpu.dot_dimension_numbers<[1], [0], [0], [1], [0, 0, 1, 1], [], []>} : vector<8x96xbf16>, vector<96x1536xbf16>, vector<8x1536xf32> -> vector<8x1536xf32>
    %c0_3 = arith.constant 0 : index
    %c0_4 = arith.constant 0 : index
    %3 = vector.load %arg6[%c0_3, %c0_4] : memref<1x1536xf32, #tpu.memory_space<vmem>>, vector<1x1536xf32>
    %4 = vector.broadcast %3 : vector<1x1536xf32> to vector<8x1536xf32>
    %5 = arith.addf %2, %4 : vector<8x1536xf32>
    %c0_5 = arith.constant 0 : index
    %c0_6 = arith.constant 0 : index
    %6 = vector.load %arg8[%c0_5, %c0_6] : memref<8x1536xf32, #tpu.memory_space<vmem>>, vector<8x1536xf32>
    tpu.vector_store %arg8[%c0_5, %c0_6], %5 {strides = array<i32>} : memref<8x1536xf32, #tpu.memory_space<vmem>>, vector<8x1536xf32>,
    %c0_7 = arith.constant 0 : index
    %c0_8 = arith.constant 0 : index
    %7 = vector.load %arg5[%c0_7, %c0_8] : memref<32x128xf32, #tpu.memory_space<vmem>>, vector<32x128xf32>
    %cst_9 = arith.constant 0.000000e+00 : f32
    %8 = vector.broadcast %cst_9 : f32 to vector<8x32xf32>
    %c0_i32 = arith.constant 0 : i32
    %c12_i32 = arith.constant 12 : i32
    %9 = arith.addi %c0_i32, %c12_i32 : i32
    %c1_i32 = arith.constant 1 : i32
    %10:3 = scf.for %arg9 = %c0_i32 to %9 step %c1_i32 iter_args(%arg10 = %8, %arg11 = %8, %arg12 = %8) -> (vector<8x32xf32>, vector<8x32xf32>, vector<8x32xf32>)  : i32 {
      %c128_i32 = arith.constant 128 : i32
      %15 = arith.muli %arg9, %c128_i32 : i32
      %16 = tpu.assume_multiple %15, 128 : i32
      %c0_14 = arith.constant 0 : index
      %17 = arith.index_cast %16 : i32 to index
      %18 = vector.load %arg8[%c0_14, %17] : memref<8x1536xf32, #tpu.memory_space<vmem>>, vector<8x128xf32>
      %cst_15 = arith.constant dense<0.000000e+00> : vector<8x128xf32>
      %19 = tpu.matmul %arg10, %7, %cst_15 {dimension_numbers = #tpu.dot_dimension_numbers<[1], [0], [0], [1], [0, 0, 1, 1], [], []>} : vector<8x32xf32>, vector<32x128xf32>, vector<8x128xf32> -> vector<8x128xf32>
      %20 = arith.addf %18, %19 : vector<8x128xf32>
      %21 = vector.extract_strided_slice %20 {offsets = [0, 0], sizes = [8, 32], strides = [1, 1]} : vector<8x128xf32> to vector<8x32xf32>
      %22 = arith.negf %21 : vector<8x32xf32>
      %23 = math.exp %22 : vector<8x32xf32>
      %cst_16 = arith.constant 1.000000e+00 : f32
      %24 = vector.broadcast %cst_16 : f32 to vector<8x32xf32>
      %25 = arith.addf %24, %23 : vector<8x32xf32>
      %26 = arith.divf %24, %25 : vector<8x32xf32>
      %27 = vector.extract_strided_slice %20 {offsets = [0, 32], sizes = [8, 32], strides = [1, 1]} : vector<8x128xf32> to vector<8x32xf32>
      %28 = arith.negf %27 : vector<8x32xf32>
      %29 = math.exp %28 : vector<8x32xf32>
      %cst_17 = arith.constant 1.000000e+00 : f32
      %30 = vector.broadcast %cst_17 : f32 to vector<8x32xf32>
      %31 = arith.addf %30, %29 : vector<8x32xf32>
      %32 = arith.divf %30, %31 : vector<8x32xf32>
      %33 = vector.extract_strided_slice %20 {offsets = [0, 64], sizes = [8, 32], strides = [1, 1]} : vector<8x128xf32> to vector<8x32xf32>
      %34 = math.tanh %33 : vector<8x32xf32>
      %35 = vector.extract_strided_slice %20 {offsets = [0, 96], sizes = [8, 32], strides = [1, 1]} : vector<8x128xf32> to vector<8x32xf32>
      %36 = arith.negf %35 : vector<8x32xf32>
      %37 = math.exp %36 : vector<8x32xf32>
      %cst_18 = arith.constant 1.000000e+00 : f32
      %38 = vector.broadcast %cst_18 : f32 to vector<8x32xf32>
      %39 = arith.addf %38, %37 : vector<8x32xf32>
      %40 = arith.divf %38, %39 : vector<8x32xf32>
      %41 = arith.mulf %32, %arg11 : vector<8x32xf32>
      %42 = arith.mulf %26, %34 : vector<8x32xf32>
      %43 = arith.addf %41, %42 : vector<8x32xf32>
      %44 = math.tanh %43 : vector<8x32xf32>
      %45 = arith.mulf %40, %44 : vector<8x32xf32>
      %46 = arith.index_cast %arg9 : i32 to index
      %47 = memref.load %arg1[%46] : memref<12xf32, #tpu.memory_space<smem>>
      %48 = vector.broadcast %47 : f32 to vector<8x32xf32>
      %49 = arith.mulf %45, %48 : vector<8x32xf32>
      %50 = arith.addf %arg12, %49 : vector<8x32xf32>
      scf.yield %45, %43, %50 : vector<8x32xf32>, vector<8x32xf32>, vector<8x32xf32>
    }
    %c12_i32_10 = arith.constant 12 : i32
    %c0_11 = arith.constant 0 : index
    %11 = memref.load %arg2[%c0_11] : memref<1xf32, #tpu.memory_space<smem>>
    %12 = vector.broadcast %11 : f32 to vector<8x32xf32>
    %13 = arith.addf %10#2, %12 : vector<8x32xf32>
    %c0_12 = arith.constant 0 : index
    %c0_13 = arith.constant 0 : index
    %14 = vector.load %arg7[%c0_12, %c0_13] : memref<8x32xf32, #tpu.memory_space<vmem>>, vector<8x32xf32>
    tpu.vector_store %arg7[%c0_12, %c0_13], %13 {strides = array<i32>} : memref<8x32xf32, #tpu.memory_space<vmem>>, vector<8x32xf32>,
    return
  }
  func.func @transform_0(%arg0: i32) -> i32 {
    %c0_i32 = arith.constant 0 : i32
    %c0_i32_0 = arith.constant 0 : i32
    return %c0_i32 : i32
  }
  func.func @transform_1(%arg0: i32) -> i32 {
    %c0_i32 = arith.constant 0 : i32
    %c0_i32_0 = arith.constant 0 : i32
    return %c0_i32 : i32
  }
  func.func @transform_2(%arg0: i32) -> (i32, i32) {
    %c0_i32 = arith.constant 0 : i32
    %c0_i32_0 = arith.constant 0 : i32
    return %arg0, %c0_i32 : i32, i32
  }
  func.func @transform_3(%arg0: i32) -> (i32, i32) {
    %c0_i32 = arith.constant 0 : i32
    %c0_i32_0 = arith.constant 0 : i32
    %c0_i32_1 = arith.constant 0 : i32
    return %c0_i32, %c0_i32_0 : i32, i32
  }
  func.func @transform_4(%arg0: i32) -> (i32, i32) {
    %c0_i32 = arith.constant 0 : i32
    %c0_i32_0 = arith.constant 0 : i32
    %c0_i32_1 = arith.constant 0 : i32
    return %c0_i32, %c0_i32_0 : i32, i32
  }
  func.func @transform_5(%arg0: i32) -> (i32, i32) {
    %c0_i32 = arith.constant 0 : i32
    %c0_i32_0 = arith.constant 0 : i32
    %c0_i32_1 = arith.constant 0 : i32
    return %c0_i32, %c0_i32_0 : i32, i32
  }
  func.func @transform_6(%arg0: i32) -> (i32, i32) {
    %c0_i32 = arith.constant 0 : i32
    %c0_i32_0 = arith.constant 0 : i32
    return %arg0, %c0_i32 : i32, i32
  }
}

</mosaic_0001>

<bundles_post_ra>
// kernel: tpu_custom_call.1
= control target key start
LH: loop header
LB: loop body
LE: loop exit
PB: predicated region body
PF: predicated region fallthrough
CT: control target
= control target key end

     0   :  { %s1565_s0 = inlined_call_operand.vmem [shape: f32[12], index: 0, kind: input, shape index: {}]   ;;  %s1566_s1 = inlined_call_operand.<no memory space> [shape: f32[1], index: 1, kind: input, shape index: {}]   ;;  %s1567_s2 = inlined_call_operand.hbm [shape: bf16[8,96], index: 2, kind: input, shape index: {}]   ;;  %s1568_s3 = inlined_call_operand.hbm [shape: bf16[96,1536], index: 3, kind: input, shape index: {}]   ;;  %s1569_s4 = inlined_call_operand.hbm [shape: f32[32,128], index: 4, kind: input, shape index: {}]   ;;  %s1570_s5 = inlined_call_operand.hbm [shape: f32[1,1536], index: 5, kind: input, shape index: {}]   ;;  %s1571_s6 = inlined_call_operand.hbm [shape: f32[8,32], index: 6, kind: output, shape index: {}]  }
   0x1   :  { %11 = sst [smem:[#allocation3]] %s1566_s1 }
   0x2   :  { %12 = vsyncpa [#allocation7], 0 }
   0x3   :  { %13 = vsyncpa [#allocation5], 0 }
   0x4   :  { %14 = vsyncpa [#allocation10], 0 }
   0x5   :  { %15 = vsyncpa [#allocation13], 0 }
   0x6   :  { %16 = vsyncpa [#allocation6], 0  ;;  %s1432_s23 = smov [#allocation9]   ;;  %s23_s27 = sshll.u32 %s1565_s0, 4  ;;  %s24_s27 = int_to_ptr.vmem [resolvable:$true] %s23_s27 }
   0x7   :  { %s44_s24 = sshll.u32 %s1432_s23, 4  ;;  %s45_s24 = int_to_ptr.vmem [resolvable:$true] %s44_s24 }
   0x8   :  { %s1286_s28 = scalar_lea.vmem %s45_s24, 9216  ;;  %p1291_p1 = scmp.lt.s32.totalorder %s45_s24, %s45_s24 }
   0x9   :  { %p1287_p0 = scmp.ne.s32.totalorder %s45_s24, %s1286_s28  ;;  %p1292_p2 = scmp.lt.s32.totalorder %s1286_s28, %s1286_s28 }
   0xb   :  { %p1293_p3 = por %p1292_p2, %p1291_p1 }
   0xd   :  { %p1294_p4 = pnand %p1293_p3, %p1287_p0 }
   0xf   :  { %1297 = shalt.err (!%p1294_p4)
}
  0x10   :  { %s1433_s1 = smov 768   ;;  %s1434_s29 = smov 48  }
  0x11   :  { %50 = dma.hbm_to_vmem [thread:$0]  %s1568_s3, 9216, %s45_s24, [#allocation10], %s1433_s1, %s1433_s1, %s1434_s29  }
  0x12   :  { %s1298_s8 = scalar_lea.vmem %s24_s27, 16  ;;  %p1303_p6 = scmp.lt.s32.totalorder %s24_s27, %s24_s27 }
  0x13   :  { %p1299_p5 = scmp.ne.s32.totalorder %s24_s27, %s1298_s8  ;;  %p1304_p7 = scmp.lt.s32.totalorder %s1298_s8, %s1298_s8 }
  0x15   :  { %p1305_p8 = por %p1304_p7, %p1303_p6 }
  0x17   :  { %p1306_p9 = pnand %p1305_p8, %p1299_p5 }
  0x19   :  { %1309 = shalt.err (!%p1306_p9)
}
  0x1a   :  { %s1435_s0 = smov [#allocation4]   ;;  %s1436_s9 = smov [#allocation8]  }
  0x1b   :  { %26 = dma.vmem_to_smem %s24_s27, 16, %s1435_s0, [#allocation7]  }
  0x1c   :  { %s35_s10 = sshll.u32 %s1436_s9, 4  ;;  %s1437_s11 = smov [#allocation11]   ;;  %s36_s10 = int_to_ptr.vmem [resolvable:$true] %s35_s10 }
  0x1d   :  { %s56_s12 = sshll.u32 %s1437_s11, 4  ;;  %s1318_s13 = scalar_lea.vmem %s36_s10, 64  ;;  %s57_s12 = int_to_ptr.vmem [resolvable:$true] %s56_s12 }
  0x1e   :  { %p1319_p10 = scmp.ne.s32.totalorder %s36_s10, %s1318_s13  ;;  %p1323_p11 = scmp.lt.s32.totalorder %s36_s10, %s36_s10 }
  0x1f   :  { %p1324_p12 = scmp.lt.s32.totalorder %s1318_s13, %s1318_s13 }
  0x21   :  { %p1325_p13 = por %p1324_p12, %p1323_p11 }
  0x23   :  { %p1326_p0 = pnand %p1325_p13, %p1319_p10 }
  0x25   :  { %1329 = shalt.err (!%p1326_p0)
}
  0x26   :  { %38 = dma.hbm_to_vmem [thread:$0]  %s1567_s2, 64, %s36_s10, [#allocation5]  }
  0x27   :  { %s1338_s15 = scalar_lea.vmem %s57_s12, 512  ;;  %p1343_p2 = scmp.lt.s32.totalorder %s57_s12, %s57_s12 }
  0x28   :  { %p1339_p1 = scmp.ne.s32.totalorder %s57_s12, %s1338_s15  ;;  %p1344_p3 = scmp.lt.s32.totalorder %s1338_s15, %s1338_s15 }
  0x2a   :  { %p1345_p4 = por %p1344_p3, %p1343_p2 }
  0x2c   :  { %p1346_p5 = pnand %p1345_p4, %p1339_p1 }
  0x2e   :  { %1349 = shalt.err (!%p1346_p5)
}
  0x2f   :  { %s1438_s16 = smov 128   ;;  %s1439_s17 = smov 8  }
  0x30   :  { %62 = dma.hbm_to_vmem [thread:$0]  %s1569_s4, 512, %s57_s12, [#allocation10], %s1438_s16, %s1438_s16, %s1439_s17  }
  0x31   :  { %s1440_s20 = smov [#allocation12]  }
  0x32   :  { %s69_s21 = sshll.u32 %s1440_s20, 4  ;;  %s70_s21 = int_to_ptr.vmem [resolvable:$true] %s69_s21 }
  0x33   :  { %s1358_s22 = scalar_lea.vmem %s70_s21, 192  ;;  %p1363_p7 = scmp.lt.s32.totalorder %s70_s21, %s70_s21 }
  0x34   :  { %p1359_p6 = scmp.ne.s32.totalorder %s70_s21, %s1358_s22  ;;  %p1364_p8 = scmp.lt.s32.totalorder %s1358_s22, %s1358_s22 }
  0x36   :  { %p1365_p9 = por %p1364_p8, %p1363_p7 }
  0x38   :  { %p1366_p10 = pnand %p1365_p9, %p1359_p6 }
  0x3a   :  { %1369 = shalt.err (!%p1366_p10)
}
  0x3b   :  { %72 = dma.hbm_to_vmem [thread:$0]  %s1570_s5, 192, %s70_s21, [#allocation13]  }
  0x3c   :  { %1406 = dma.done.wait [#allocation7], 16  }
  0x3d   :  { %1407 = vsyncadd [#allocation7], 4294967280 }
  0x3e   :  { %1408 = dma.done.wait [#allocation5], 64  }
  0x3f   :  { %1409 = vsyncadd [#allocation5], 4294967232 }
  0x40   :  { %1410 = dma.done.wait [#allocation10], 9728  }
  0x41   :  { %1411 = vsyncadd [#allocation10], 4294957568 }
  0x42   :  { %1412 = dma.done.wait [#allocation13], 192  }
  0x43   :  { %1413 = vsyncadd [#allocation13], 4294967104 }
  0x44   :  { %88 = sfence }
  0x45   :  { %v1162_v0 = vld [vmem:[#allocation9 + $0x1e4] ss:$48 sps:$4 sm:$0xff]   ;;  %v1164_v1 = vld [vmem:[#allocation9 + $0x1ec] ss:$48 sps:$4 sm:$0xff]   ;;  %v1441_v2 = vmov 0   ;;  %vm587_vm0 = vcmask 785408  }
  0x46   :  { %623 = vmatprep.mubr.bf16.mxu0 %v1441_v2  ;;  %664 = vmatprep.mubr.bf16.mxu1 %v1441_v2  ;;  %v1166_v3 = vld [vmem:[#allocation9 + $0x1e0] ss:$48 sps:$4 sm:$0xff]   ;;  %v1167_v4 = vld [vmem:[#allocation9 + $0x1e8] ss:$48 sps:$4 sm:$0xff]   ;;  %v1168_v5 = vld [vmem:[#allocation9 + $0x184] ss:$48 sps:$4 sm:$0xff]  }
  0x47   :  { %595 = vmatprep.subr.bf16.mxu0 %v1162_v0  ;;  %636 = vmatprep.subr.bf16.mxu1 %v1164_v1  ;;  %v1170_v6 = vld [vmem:[#allocation9 + $0x18c] ss:$48 sps:$4 sm:$0xff]   ;;  %v1172_v7 = vld [vmem:[#allocation9 + $0x180] ss:$48 sps:$4 sm:$0xff]   ;;  %v1173_v8 = vld [vmem:[#allocation9 + $0x188] ss:$48 sps:$4 sm:$0xff]  }
  0x48   :  { %596 = vmatpush1.bf16.msra.mxu0 %v1166_v3  ;;  %637 = vmatpush1.bf16.msra.mxu1 %v1167_v4  ;;  %v1174_v9 = vld [vmem:[#allocation9 + $0x124] ss:$48 sps:$4 sm:$0xff]   ;;  %v1176_v10 = vld [vmem:[#allocation9 + $0x12c] ss:$48 sps:$4 sm:$0xff]   ;;  %v1178_v11 = vld [vmem:[#allocation9 + $0x120] ss:$48 sps:$4 sm:$0xff]  }
  0x49   :  { %597 = vmatprep.subr.bf16.mxu0 %v1168_v5  ;;  %638 = vmatprep.subr.bf16.mxu1 %v1170_v6  ;;  %v1179_v12 = vld [vmem:[#allocation9 + $0x128] ss:$48 sps:$4 sm:$0xff]   ;;  %v1180_v13 = vld [vmem:[#allocation9 + $0xc4] ss:$48 sps:$4 sm:$0xff]   ;;  %v1182_v14 = vld [vmem:[#allocation9 + $0xcc] ss:$48 sps:$4 sm:$0xff]  }
  0x4a   :  { %v1184_v15 = vld [vmem:[#allocation9 + $0xc0] ss:$48 sps:$4 sm:$0xff]   ;;  %v1185_v16 = vld [vmem:[#allocation9 + $0xc8] ss:$48 sps:$4 sm:$0xff]   ;;  %v1186_v17 = vld [vmem:[#allocation9 + $0x64] ss:$48 sps:$4 sm:$0xff]  }
  0x4b   :  { %v1188_v18 = vld [vmem:[#allocation9 + $0x6c] ss:$48 sps:$4 sm:$0xff]   ;;  %v1190_v19 = vld [vmem:[#allocation9 + $0x60] ss:$48 sps:$4 sm:$0xff]   ;;  %v1191_v20 = vld [vmem:[#allocation9 + $0x68] ss:$48 sps:$4 sm:$0xff]  }
  0x4c   :  { %598 = vmatpush1.bf16.msra.mxu0 %v1172_v7  ;;  %639 = vmatpush1.bf16.msra.mxu1 %v1173_v8  ;;  %v1192_v21 = vld [vmem:[#allocation9 + $0x4] ss:$48 sps:$4 sm:$0xff]   ;;  %v1194_v22 = vld [vmem:[#allocation9 + $0xc] ss:$48 sps:$4 sm:$0xff]   ;;  %v1196_v23 = vld [vmem:[#allocation9] ss:$48 sps:$4 sm:$0xff]  }
  0x4d   :  { %599 = vmatprep.subr.bf16.mxu0 %v1174_v9  ;;  %640 = vmatprep.subr.bf16.mxu1 %v1176_v10  ;;  %v1197_v24 = vld [vmem:[#allocation9 + $0x8] ss:$48 sps:$4 sm:$0xff]   ;;  %v1200_v25 = vld [vmem:[#allocation9 + $0x1f4] ss:$48 sps:$4 sm:$0xff]   ;;  %v1203_v26 = vld [vmem:[#allocation9 + $0x1fc] ss:$48 sps:$4 sm:$0xff]  }
  0x4e   :  { %v1503_v27 = vld [vmem:[#allocation8] sm:$0xf]  ;;  %v1198_v28 = vld [vmem:[#allocation9 + $0x1f0] ss:$48 sps:$4 sm:$0xff]   ;;  %v1201_v29 = vld [vmem:[#allocation9 + $0x1f8] ss:$48 sps:$4 sm:$0xff]  }
  0x4f   :  { %v1206_v30 = vld [vmem:[#allocation9 + $0x194] ss:$48 sps:$4 sm:$0xff]   ;;  %v1209_v31 = vld [vmem:[#allocation9 + $0x19c] ss:$48 sps:$4 sm:$0xff]   ;;  %v1204_v32 = vld [vmem:[#allocation9 + $0x190] ss:$48 sps:$4 sm:$0xff]  }
  0x50   :  { %600 = vmatpush1.bf16.msra.mxu0 %v1178_v11  ;;  %641 = vmatpush1.bf16.msra.mxu1 %v1179_v12  ;;  %v1207_v33 = vld [vmem:[#allocation9 + $0x198] ss:$48 sps:$4 sm:$0xff]   ;;  %v1212_v34 = vld [vmem:[#allocation9 + $0x134] ss:$48 sps:$4 sm:$0xff]   ;;  %v1215_v35 = vld [vmem:[#allocation9 + $0x13c] ss:$48 sps:$4 sm:$0xff]  }
  0x51   :  { %601 = vmatprep.subr.bf16.mxu0 %v1180_v13  ;;  %642 = vmatprep.subr.bf16.mxu1 %v1182_v14  ;;  %v1210_v36 = vld [vmem:[#allocation9 + $0x130] ss:$48 sps:$4 sm:$0xff]   ;;  %v1213_v37 = vld [vmem:[#allocation9 + $0x138] ss:$48 sps:$4 sm:$0xff]   ;;  %v1218_v38 = vld [vmem:[#allocation9 + $0xd4] ss:$48 sps:$4 sm:$0xff]   ;;  %v167_v14 = vlaneseq }
  0x52   :  { %v1221_v39 = vld [vmem:[#allocation9 + $0xdc] ss:$48 sps:$4 sm:$0xff]   ;;  %v1216_v40 = vld [vmem:[#allocation9 + $0xd0] ss:$48 sps:$4 sm:$0xff]   ;;  %v1219_v41 = vld [vmem:[#allocation9 + $0xd8] ss:$48 sps:$4 sm:$0xff]  }
  0x53   :  { %v1224_v42 = vld [vmem:[#allocation9 + $0x74] ss:$48 sps:$4 sm:$0xff]   ;;  %v1227_v43 = vld [vmem:[#allocation9 + $0x7c] ss:$48 sps:$4 sm:$0xff]   ;;  %v1222_v44 = vld [vmem:[#allocation9 + $0x70] ss:$48 sps:$4 sm:$0xff]  }
  0x54   :  { %602 = vmatpush1.bf16.msra.mxu0 %v1184_v15  ;;  %643 = vmatpush1.bf16.msra.mxu1 %v1185_v16  ;;  %v1225_v45 = vld [vmem:[#allocation9 + $0x78] ss:$48 sps:$4 sm:$0xff]   ;;  %v1230_v46 = vld [vmem:[#allocation9 + $0x14] ss:$48 sps:$4 sm:$0xff]   ;;  %v1233_v47 = vld [vmem:[#allocation9 + $0x1c] ss:$48 sps:$4 sm:$0xff]  }
  0x55   :  { %603 = vmatprep.subr.bf16.mxu0 %v1186_v17  ;;  %644 = vmatprep.subr.bf16.mxu1 %v1188_v18  ;;  %v1228_v48 = vld [vmem:[#allocation9 + $0x10] ss:$48 sps:$4 sm:$0xff]   ;;  %v1231_v49 = vld [vmem:[#allocation9 + $0x18] ss:$48 sps:$4 sm:$0xff]   ;;  %v1236_v50 = vld [vmem:[#allocation9 + $0x204] ss:$48 sps:$4 sm:$0xff]  }
  0x56   :  { %v1239_v51 = vld [vmem:[#allocation9 + $0x20c] ss:$48 sps:$4 sm:$0xff]   ;;  %v1234_v52 = vld [vmem:[#allocation9 + $0x200] ss:$48 sps:$4 sm:$0xff]   ;;  %v1237_v53 = vld [vmem:[#allocation9 + $0x208] ss:$48 sps:$4 sm:$0xff]  }
  0x57   :  { %v1242_v54 = vld [vmem:[#allocation9 + $0x1a4] ss:$48 sps:$4 sm:$0xff]   ;;  %v1245_v55 = vld [vmem:[#allocation9 + $0x1ac] ss:$48 sps:$4 sm:$0xff]   ;;  %v1240_v56 = vld [vmem:[#allocation9 + $0x1a0] ss:$48 sps:$4 sm:$0xff]  }
  0x58   :  { %604 = vmatpush1.bf16.msra.mxu0 %v1190_v19  ;;  %645 = vmatpush1.bf16.msra.mxu1 %v1191_v20  ;;  %v1243_v57 = vld [vmem:[#allocation9 + $0x1a8] ss:$48 sps:$4 sm:$0xff]   ;;  %v1248_v58 = vld [vmem:[#allocation9 + $0x144] ss:$48 sps:$4 sm:$0xff]   ;;  %v1251_v59 = vld [vmem:[#allocation9 + $0x14c] ss:$48 sps:$4 sm:$0xff]  }
  0x59   :  { %605 = vmatprep.subr.bf16.mxu0 %v1192_v21  ;;  %646 = vmatprep.subr.bf16.mxu1 %v1194_v22  ;;  %v1246_v60 = vld [vmem:[#allocation9 + $0x140] ss:$48 sps:$4 sm:$0xff]   ;;  %v1249_v61 = vld [vmem:[#allocation9 + $0x148] ss:$48 sps:$4 sm:$0xff]   ;;  %v1254_v62 = vld [vmem:[#allocation9 + $0xe4] ss:$48 sps:$4 sm:$0xff]  }
  0x5a   :  { %v1257_v63 = vld [vmem:[#allocation9 + $0xec] ss:$48 sps:$4 sm:$0xff]   ;;  %v1252_v0 = vld [vmem:[#allocation9 + $0xe0] ss:$48 sps:$4 sm:$0xff]   ;;  %v1255_v1 = vld [vmem:[#allocation9 + $0xe8] ss:$48 sps:$4 sm:$0xff]  }
  0x5b   :  { %v1260_v3 = vld [vmem:[#allocation9 + $0x84] ss:$48 sps:$4 sm:$0xff]   ;;  %v1263_v4 = vld [vmem:[#allocation9 + $0x8c] ss:$48 sps:$4 sm:$0xff]   ;;  %v1258_v5 = vld [vmem:[#allocation9 + $0x80] ss:$48 sps:$4 sm:$0xff]  }
  0x5c   :  { %606 = vmatpush1.bf16.msra.mxu0 %v1196_v23  ;;  %647 = vmatpush1.bf16.msra.mxu1 %v1197_v24  ;;  %v1266_v6 = vld [vmem:[#allocation9 + $0x24] ss:$48 sps:$4 sm:$0xff]   ;;  %v1269_v7 = vld [vmem:[#allocation9 + $0x2c] ss:$48 sps:$4 sm:$0xff]   ;;  %v1264_v8 = vld [vmem:[#allocation9 + $0x20] ss:$48 sps:$4 sm:$0xff]  }
  0x5d   :  { %677 = vmatprep.subr.bf16.mxu0 %v1200_v25  ;;  %718 = vmatprep.subr.bf16.mxu1 %v1203_v26  ;;  %v1267_v9 = vld [vmem:[#allocation9 + $0x28] ss:$48 sps:$4 sm:$0xff]   ;;  %v1521_v10 = vld [vmem:[#allocation11] sm:$0xff]  ;;  %v1525_v12 = vld [vmem:[#allocation11 + $0x10] sm:$0xff]  ;;  %v168_v15 = vshrl.u32 %v167_v14, 7  ;;  %v1529_v14 = vmov 0.0  }
  0x5e   :  { %v1523_v11 = vld [vmem:[#allocation11 + $0x8] sm:$0xff]  ;;  %v1527_v13 = vld [vmem:[#allocation11 + $0x18] sm:$0xff]  ;;  %v163_v18 = vld [vmem:[#allocation12] sm:$0xff]  ;;  %s1535_s4 = smov 0  }
  0x5f   :  { %1088 = vmatmul.mubr.msk.bf16.vlgmr.msra.gmra.mxu0 %vm587_vm0, %v1503_v27  ;;  %1089 = vmatmul.mubr.msk.bf16.vlgmr.msra.gmra.mxu1 %vm587_vm0, %v1503_v27  ;;  %v169_v16 = vsub.s32 0, %v168_v15  ;;  %v177_v17 = vsub.s32 2, %v168_v15  ;;  %v173_v19 = vsub.s32 1, %v168_v15  ;;  %v181_v20 = vsub.s32 3, %v168_v15 }
  0x60   :  { %678 = vmatpush1.bf16.msra.mxu0 %v1198_v28  ;;  %719 = vmatpush1.bf16.msra.mxu1 %v1201_v29 }
  0x61   :  { %679 = vmatprep.subr.bf16.mxu0 %v1206_v30  ;;  %720 = vmatprep.subr.bf16.mxu1 %v1209_v31  ;;  %v170_v21 = vrot.slane %v163_v18, %v169_v16  ;;  %v178_v22 = vrot.slane %v163_v18, %v177_v17  ;;  %v174_v23 = vrot.slane %v163_v18, %v173_v19 }
  0x62   :  { %705 = vmatprep.mubr.bf16.mxu0 %v1441_v2  ;;  %746 = vmatprep.mubr.bf16.mxu1 %v1441_v2  ;;  %v182_v24 = vrot.slane %v163_v18, %v181_v20 }
  0x64   :  { %680 = vmatpush1.bf16.msra.mxu0 %v1204_v32  ;;  %721 = vmatpush1.bf16.msra.mxu1 %v1207_v33 }
  0x65   :  { %681 = vmatprep.subr.bf16.mxu0 %v1212_v34  ;;  %722 = vmatprep.subr.bf16.mxu1 %v1215_v35 }
  0x68   :  { %682 = vmatpush1.bf16.msra.mxu0 %v1210_v36  ;;  %723 = vmatpush1.bf16.msra.mxu1 %v1213_v37  ;;  %v185_v37 = vsub.s32 4, %v168_v15 }
  0x69   :  { %683 = vmatprep.subr.bf16.mxu0 %v1218_v38  ;;  %724 = vmatprep.subr.bf16.mxu1 %v1221_v39  ;;  %v193_v38 = vsub.s32 6, %v168_v15  ;;  %v189_v39 = vsub.s32 5, %v168_v15 }
  0x6c   :  { %684 = vmatpush1.bf16.msra.mxu0 %v1216_v40  ;;  %725 = vmatpush1.bf16.msra.mxu1 %v1219_v41  ;;  %v197_v40 = vsub.s32 7, %v168_v15  ;;  %v186_v41 = vrot.slane %v163_v18, %v185_v37  ;;  %v1531_v15 = vmov 0.0  }
  0x6d   :  { %685 = vmatprep.subr.bf16.mxu0 %v1224_v42  ;;  %726 = vmatprep.subr.bf16.mxu1 %v1227_v43  ;;  %v194_v42 = vrot.slane %v163_v18, %v193_v38  ;;  %v190_v43 = vrot.slane %v163_v18, %v189_v39 }
  0x70   :  { %686 = vmatpush1.bf16.msra.mxu0 %v1222_v44  ;;  %727 = vmatpush1.bf16.msra.mxu1 %v1225_v45  ;;  %v198_v44 = vrot.slane %v163_v18, %v197_v40 }
  0x71   :  { %687 = vmatprep.subr.bf16.mxu0 %v1230_v46  ;;  %728 = vmatprep.subr.bf16.mxu1 %v1233_v47 }
  0x74   :  { %688 = vmatpush1.bf16.msra.mxu0 %v1228_v48  ;;  %729 = vmatpush1.bf16.msra.mxu1 %v1231_v49 }
  0x75   :  { %759 = vmatprep.subr.bf16.mxu0 %v1236_v50  ;;  %800 = vmatprep.subr.bf16.mxu1 %v1239_v51 }
  0x77   :  { %1090 = vmatmul.mubr.msk.bf16.vlgmr.msra.gmra.mxu0 %vm587_vm0, %v1503_v27  ;;  %1091 = vmatmul.mubr.msk.bf16.vlgmr.msra.gmra.mxu1 %vm587_vm0, %v1503_v27 }
  0x78   :  { %760 = vmatpush1.bf16.msra.mxu0 %v1234_v52  ;;  %801 = vmatpush1.bf16.msra.mxu1 %v1237_v53 }
  0x79   :  { %761 = vmatprep.subr.bf16.mxu0 %v1242_v54  ;;  %802 = vmatprep.subr.bf16.mxu1 %v1245_v55 }
  0x7a   :  { %787 = vmatprep.mubr.bf16.mxu0 %v1441_v2  ;;  %828 = vmatprep.mubr.bf16.mxu1 %v1441_v2  ;;  %v1261_v2 = vld [vmem:[#allocation9 + $0x88] ss:$48 sps:$4 sm:$0xff]  }
  0x7c   :  { %762 = vmatpush1.bf16.msra.mxu0 %v1240_v56  ;;  %803 = vmatpush1.bf16.msra.mxu1 %v1243_v57  ;;  %v164_v57 = vld [vmem:[#allocation12 + $0x8] sm:$0xf] }
  0x7d   :  { %763 = vmatprep.subr.bf16.mxu0 %v1248_v58  ;;  %804 = vmatprep.subr.bf16.mxu1 %v1251_v59  ;;  %v202_v58 = vrot.slane %v164_v57, %v169_v16  ;;  %v210_v59 = vrot.slane %v164_v57, %v177_v17  ;;  %v1533_v16 = vmov 0.0  }
  0x80   :  { %764 = vmatpush1.bf16.msra.mxu0 %v1246_v60  ;;  %805 = vmatpush1.bf16.msra.mxu1 %v1249_v61  ;;  %v206_v60 = vrot.slane %v164_v57, %v173_v19  ;;  %v214_v61 = vrot.slane %v164_v57, %v181_v20 }
  0x81   :  { %765 = vmatprep.subr.bf16.mxu0 %v1254_v62  ;;  %806 = vmatprep.subr.bf16.mxu1 %v1257_v63 }
  0x84   :  { %766 = vmatpush1.bf16.msra.mxu0 %v1252_v0  ;;  %807 = vmatpush1.bf16.msra.mxu1 %v1255_v1 }
  0x85   :  { %767 = vmatprep.subr.bf16.mxu0 %v1260_v3  ;;  %808 = vmatprep.subr.bf16.mxu1 %v1263_v4 }
  0x88   :  { %768 = vmatpush1.bf16.msra.mxu0 %v1258_v5  ;;  %809 = vmatpush1.bf16.msra.mxu1 %v1261_v2 }
  0x89   :  { %769 = vmatprep.subr.bf16.mxu0 %v1266_v6  ;;  %810 = vmatprep.subr.bf16.mxu1 %v1269_v7 }
  0x8c   :  { %770 = vmatpush1.bf16.msra.mxu0 %v1264_v8  ;;  %811 = vmatpush1.bf16.msra.mxu1 %v1267_v9 }
  0x8f   :  { %1092 = vmatmul.mubr.msk.bf16.vlgmr.msra.gmra.mxu0 %vm587_vm0, %v1503_v27  ;;  %1093 = vmatmul.mubr.msk.bf16.vlgmr.msra.gmra.mxu1 %vm587_vm0, %v1503_v27 }
 0x11f   :  { %v625_v25 = vpop.f32.mrf.mxu0  ;;  %v666_v26 = vpop.f32.mrf.mxu1 }
 0x120   :  { %v626_v27 = vadd.f32 %v625_v25, %v170_v21  ;;  %v667_v28 = vadd.f32 %v666_v26, %v178_v22 }
 0x121   :  { %v627_v29 = vpop.f32.mrf.mxu0  ;;  %v668_v30 = vpop.f32.mrf.mxu1 }
 0x122   :  { %837 = vst [vmem:[#allocation2] sm:$0xff] %v626_v27  ;;  %839 = vst [vmem:[#allocation2 + $0x10] sm:$0xff] %v667_v28  ;;  %v628_v31 = vadd.f32 %v627_v29, %v174_v23  ;;  %v669_v32 = vadd.f32 %v668_v30, %v182_v24 }
 0x123   :  { %v629_v33 = vpop.f32.mrf.mxu0  ;;  %v670_v34 = vpop.f32.mrf.mxu1 }
 0x124   :  { %838 = vst [vmem:[#allocation2 + $0x8] sm:$0xff] %v628_v31  ;;  %840 = vst [vmem:[#allocation2 + $0x18] sm:$0xff] %v669_v32 }
 0x125   :  { %v630_v35 = vpop.f32.mrf.mxu0  ;;  %v671_v36 = vpop.f32.mrf.mxu1 }
 0x137   :  { %v707_v45 = vpop.f32.mrf.mxu0  ;;  %v748_v46 = vpop.f32.mrf.mxu1 }
 0x138   :  { %v708_v47 = vadd.f32 %v707_v45, %v186_v41  ;;  %v749_v48 = vadd.f32 %v748_v46, %v194_v42 }
 0x139   :  { %v709_v49 = vpop.f32.mrf.mxu0  ;;  %v750_v50 = vpop.f32.mrf.mxu1 }
 0x13a   :  { %841 = vst [vmem:[#allocation2 + $0x20] sm:$0xff] %v708_v47  ;;  %843 = vst [vmem:[#allocation2 + $0x30] sm:$0xff] %v749_v48  ;;  %v710_v51 = vadd.f32 %v709_v49, %v190_v43  ;;  %v751_v52 = vadd.f32 %v750_v50, %v198_v44 }
 0x13b   :  { %v711_v53 = vpop.f32.mrf.mxu0  ;;  %v752_v54 = vpop.f32.mrf.mxu1 }
 0x13c   :  { %842 = vst [vmem:[#allocation2 + $0x28] sm:$0xff] %v710_v51  ;;  %844 = vst [vmem:[#allocation2 + $0x38] sm:$0xff] %v751_v52 }
 0x13d   :  { %v712_v55 = vpop.f32.mrf.mxu0  ;;  %v753_v56 = vpop.f32.mrf.mxu1 }
 0x14f   :  { %v789_v62 = vpop.f32.mrf.mxu0  ;;  %v830_v63 = vpop.f32.mrf.mxu1 }
 0x150   :  { %v790_v0 = vadd.f32 %v789_v62, %v202_v58  ;;  %v831_v1 = vadd.f32 %v830_v63, %v210_v59 }
 0x151   :  { %v791_v3 = vpop.f32.mrf.mxu0  ;;  %v832_v4 = vpop.f32.mrf.mxu1 }
 0x152   :  { %845 = vst [vmem:[#allocation2 + $0x40] sm:$0xff] %v790_v0  ;;  %847 = vst [vmem:[#allocation2 + $0x50] sm:$0xff] %v831_v1  ;;  %v792_v5 = vadd.f32 %v791_v3, %v206_v60  ;;  %v833_v2 = vadd.f32 %v832_v4, %v214_v61 }
 0x153   :  { %v793_v6 = vpop.f32.mrf.mxu0  ;;  %v834_v7 = vpop.f32.mrf.mxu1 }
 0x154   :  { %846 = vst [vmem:[#allocation2 + $0x48] sm:$0xff] %v792_v5  ;;  %848 = vst [vmem:[#allocation2 + $0x58] sm:$0xff] %v833_v2 }
 0x155   :  { %v794_v8 = vpop.f32.mrf.mxu0  ;;  %v835_v9 = vpop.f32.mrf.mxu1 }
 0x156 LB: > { %v1442_v17 = vmov 0.0   ;;  %vm1443_vm1 = vmmov 0   ;;  %s1444_s5 = smov 32   ;;  %vm871_vm2 = vcmask 261120   ;;  %s1094_s24 = sshll.u32 %s1430_s4, 7  ;;  %s1430_s4 = sphi %s1535_s4, %s858_s4   ;;  %v1426_v16 = vphi %v1533_v16, %v968_v16   ;;  %v1422_v15 = vphi %v1531_v15, %v962_v15   ;;  %v1418_v14 = vphi %v1529_v14, %v1572_v14  }
 0x157   : > { %1103 = vmatprep.subr.mxu0 %v1442_v17  ;;  %1111 = vmatprep.mubr.msk.f32.mxu0 %vm1443_vm1, %v1442_v17  ;;  %s863_s25 = sshra.s32 %s1094_s24, 7  ;;  %s1445_s28 = smov 64  }
 0x158   : > { %869 = vrot.lane.b32.xlu0 %v1426_v16, %s1444_s5  ;;  %1104 = vmatpush3.msra.mxu0 %v1527_v13  ;;  %s1095_s26 = sshll.u32 %s863_s25, 3  ;;  %s969_s1 = sld [smem:[#allocation4 + %s1430_s4]] }
 0x159   : > { %1105 = vmatprep.subr.mxu0 %v1442_v17  ;;  %s866_s27 = scalar_lea.vmem [#allocation2], %s1095_s26  ;;  %s858_s4 = sadd.s32 1, %s1430_s4  }
 0x15a   : > { %1106 = vmatpush3.msra.mxu0 %v1525_v12  ;;  %p855_p11 = scmp.ge.s32.totalorder %s858_s4, 12  }
 0x15b   : > { %1107 = vmatprep.subr.mxu0 %v1442_v17  ;;  %v867_v19 = vld [vmem:[%s866_s27] sm:$0xff]  ;;  %s973_s29 = sld [smem:[#allocation3]] (%p855_p11)  ;;  %s1446_s30 = smov (%p855_p11), 32  }
 0x15c   : > { %1108 = vmatpush3.msra.mxu0 %v1523_v11  ;;  %s1447_s7 = smov (%p855_p11), [#allocation14]  }
 0x15d   : > { %1109 = vmatprep.subr.mxu0 %v1442_v17  ;;  %s988_s8 = sshll.u32 (%p855_p11), %s1447_s7, 4  ;;  %s989_s8 = int_to_ptr.vmem [resolvable:$true] %s988_s8 }
 0x15e   : > { %1110 = vmatpush3.msra.mxu0 %v1521_v10  ;;  %v970_v33 = vstv %s969_s1  ;;  %s1370_s0 = scalar_lea.vmem (%p855_p11), %s989_s8, 128  ;;  %p1375_p13 = scmp.lt.s32.totalorder (%p855_p11), %s989_s8, %s989_s8 }
 0x15f   :  { %p1371_p12 = scmp.ne.s32.totalorder (%p855_p11), %s989_s8, %s1370_s0  ;;  %p1376_p0 = scmp.lt.s32.totalorder (%p855_p11), %s1370_s0, %s1370_s0 }
 0x161   :  { %v974_v37 = vstv (%p855_p11), %s973_s29  ;;  %p1377_p1 = por (%p855_p11), %p1376_p0, %p1375_p13 }
 0x163   :  { %p1378_p2 = pnand (%p855_p11), %p1377_p1, %p1371_p12 }
 0x1ca   : > { %v870_v18 = vpop.permute.xlu0 %869 }
 0x1cb   : > { %1112 = vmatmul.mubr.msk.f32.vlgmr.msra.gmra.mxu0 %vm871_vm2, %v870_v18 }
 0x28b   : > { %v940_v20 = vpop.f32.mrf.mxu0 }
 0x28c   : > { %v944_v21 = vadd.f32 %v940_v20, %v867_v19 }
 0x28d   : > { %v1113_v22 = vpop.f32.mrf.mxu0 }
 0x28e   : > { %1270 = vtanh.f32 %v944_v21  ;;  %v1097_v24 = vmul.f32 -1.442695, %v944_v21 }
 0x290   : > { %1272 = vpow2.f32 %v1097_v24 }
 0x29b   : > { %v1271_v23 = vpop.eup %1270 }
 0x29c   : > { %954 = vrot.lane.b32.xlu0 %v1271_v23, %s1445_s28 }
 0x29d   : > { %v1273_v25 = vpop.eup %1272 }
 0x29e   : > { %v948_v26 = vadd.f32 1.0, %v1273_v25 }
 0x2a0   : > { %1274 = vrcp.f32 %v948_v26 }
 0x2ad   : > { %v1275_v27 = vpop.eup %1274 }
 0x2ae   : > { %v952_v30 = vmul.f32 %v1422_v15, %v1275_v27 }
 0x30e   : > { %v955_v28 = vpop.permute.xlu0 %954 }
 0x30f   : > { %v957_v29 = vmul.f32 %v1275_v27, %v955_v28 }
 0x311   : > { %959 = vrot.lane.b32.xlu1 %v957_v29, %s1444_s5 }
 0x383   : > { %v960_v31 = vpop.permute.xlu1 %959 }
 0x384   : > { %v962_v15 = vadd.f32 %v960_v31, %v952_v30  }
 0x386   : > { %1276 = vtanh.f32 %v962_v15 }
 0x393   : > { %v1277_v32 = vpop.eup %1276 }
 0x394   : > { %965 = vrot.lane.b32.xlu1 %v1277_v32, %s1445_s28 }
 0x406   : > { %v966_v34 = vpop.permute.xlu1 %965 }
 0x407   : > { %v968_v16 = vmul.f32 %v1275_v27, %v966_v34  }
 0x409   : > { %v971_v35 = vmul.f32 %v970_v33, %v968_v16  ;;  %857 = sbr.rel (!%p855_p11) target bundleno = 342 (0x156), region = 72 }
 0x40b   : > { %v972_v36 = vadd.f32 %v1418_v14, %v971_v35  }
 0x40d   : > { %v1572_v14 = vmov %v972_v36  ;;  %v975_v38 = vadd.f32 (%p855_p11), %v974_v37, %v972_v36 }
 0x40f   :  { %977 = vrot.lane.b32.xlu0 %v975_v38, %s1446_s30 }
 0x481   :  { %v978_v39 = vpop.permute.xlu0 %977 }
 0x482   :  { %981 = vst.msk [vmem:[#allocation14] sm:$0xff] %vm871_vm2, %v978_v39 }
 0x483   :  { %1381 = shalt.err (!%p1378_p2)
}
 0x484   :  { %991 = dma.vmem_to_hbm [thread:$0]  %s989_s8, 128, %s1571_s6, [#allocation6]  }
 0x485   :  { %1414 = dma.done.wait [#allocation6], 128  }
 0x486   :  { %1415 = vsyncadd [#allocation6], 4294967168 }
 0x487   :  { %995 = vsyncpa [#allocation5], 1 }
 0x488   :  { %996 = vsyncpa [#allocation10], 1 }
 0x489   :  { %997 = vsyncpa [#allocation13], 1 }
 0x48a   :  { %998 = vsyncpa [#allocation6], 1 }
 0x48b   :  { %999 = vsyncpa [#allocation7], 1 }

</bundles_post_ra>
